<compile_context>
chip_gen: v7x
topology: tpu7x:2x2x1
jax: 0.10.0
libtpu: 0.0.40
codegen_flags: <defaults>
</compile_context>

<pallas_src>
import math

import jax
import jax.numpy as jnp
from jax.experimental import pallas as pl
from jax.experimental.pallas import tpu as pltpu


def _softmax_and_out(scores, v, o_ref, w_ref):
    """Row softmax of f32 scores, write weights (input dtype) and P @ V."""
    m = jnp.max(scores, axis=-1, keepdims=True)
    e = jnp.exp(scores - m)                        # EUP; scores dead after this
    denom = jnp.sum(e, axis=-1, keepdims=True)
    w = e * pl.reciprocal(denom, approx=True)      # (TQ, K) attention weights
    # TODO(synk): nn.Dropout on the attention weights is identity in eval mode;
    # training-mode stochastic dropout is not modeled here.
    o_ref[0] = jnp.dot(w.astype(v.dtype), v,
                       preferred_element_type=jnp.float32).astype(o_ref.dtype)
    w_ref[0] = w.astype(w_ref.dtype)


def _attn_kernel_masked(q_ref, k_ref, v_ref, vl_ref, o_ref, w_ref):
    # One (batch, Q-tile) per grid step.
    q = q_ref[0]                                   # (TQ, D)  native dtype
    k = k_ref[0]                                   # (K, D)   native dtype
    v = v_ref[0]                                   # (K, Dv)  native dtype
    inv_sqrt_d = 1.0 / math.sqrt(q.shape[-1])

    # Q @ K^T without a transposed K tile: contract last dims on the MXU.
    scores = jax.lax.dot_general(
        q, k,
        dimension_numbers=(((1,), (1,)), ((), ())),
        preferred_element_type=jnp.float32)         # (TQ, K) f32 accumulate

    # masked_softmax: scale, then fill masked positions with -1e6 (fused).
    vl = vl_ref[0]                                  # (TQ, 1) int32
    col = jax.lax.broadcasted_iota(jnp.int32, scores.shape, 1)
    scores = jnp.where(col < vl, scores * inv_sqrt_d, jnp.float32(-1000000.0))
    _softmax_and_out(scores, v, o_ref, w_ref)


def _attn_kernel_unmasked(q_ref, k_ref, v_ref, o_ref, w_ref):
    q = q_ref[0]
    k = k_ref[0]
    v = v_ref[0]
    inv_sqrt_d = 1.0 / math.sqrt(q.shape[-1])
    scores = jax.lax.dot_general(
        q, k,
        dimension_numbers=(((1,), (1,)), ((), ())),
        preferred_element_type=jnp.float32) * inv_sqrt_d
    _softmax_and_out(scores, v, o_ref, w_ref)


def dot_product_attention(queries, keys, values, valid_lens=None, *, tq=256):
    """queries (B,Q,D), keys (B,K,D), values (B,K,Dv); valid_lens None, (B,) or (B,Q).

    Returns (output (B,Q,Dv), attention_weights (B,Q,K) in the input dtype)."""
    B, Q, D = queries.shape
    _, K, _ = keys.shape
    Dv = values.shape[-1]

    TQ = min(Q, tq)                      # Q-tile; full Q for small problems
    grid = (B, pl.cdiv(Q, TQ))

    w_dtype = queries.dtype              # lane-dense, half-width for bf16 inputs
    itemsize = jnp.dtype(queries.dtype).itemsize
    w_itemsize = jnp.dtype(w_dtype).itemsize

    flops = 2 * B * Q * K * (D + Dv)
    bytes_accessed = (
        B * Q * D * itemsize + B * K * D * itemsize + B * K * Dv * itemsize
        + (0 if valid_lens is None else B * Q * 4)    # valid_lens
        + B * Q * Dv * itemsize                       # output
        + B * Q * K * w_itemsize)                     # attention weights
    cost = pl.CostEstimate(flops=flops, transcendentals=B * Q * K,
                           bytes_accessed=bytes_accessed)

    # Per-step VMEM (double-buffered blocks) with generous headroom; clamp so
    # the request also fits v7x's 64 MiB physical VMEM.
    per_step = (TQ * D + K * D + K * Dv + TQ * Dv) * itemsize \
        + TQ * K * w_itemsize + TQ * 4
    vmem_limit = int(min(64 * 1024 * 1024, max(32 * 1024 * 1024, 3 * per_step)))

    q_spec = pl.BlockSpec((1, TQ, D), lambda b, qi: (b, qi, 0))
    k_spec = pl.BlockSpec((1, K, D), lambda b, qi: (b, 0, 0))    # invariant in qi
    v_spec = pl.BlockSpec((1, K, Dv), lambda b, qi: (b, 0, 0))   # invariant in qi
    out_specs = [
        pl.BlockSpec((1, TQ, Dv), lambda b, qi: (b, qi, 0)),
        pl.BlockSpec((1, TQ, K), lambda b, qi: (b, qi, 0)),
    ]
    out_shape = (
        jax.ShapeDtypeStruct((B, Q, Dv), queries.dtype),
        jax.ShapeDtypeStruct((B, Q, K), w_dtype),
    )
    compiler_params = pltpu.CompilerParams(
        dimension_semantics=("parallel", "parallel"),
        vmem_limit_bytes=vmem_limit)

    if valid_lens is None:
        grid_spec = pltpu.PrefetchScalarGridSpec(
            num_scalar_prefetch=0,
            grid=grid,
            in_specs=[q_spec, k_spec, v_spec],
            out_specs=out_specs,
        )
        out, weights = pl.pallas_call(
            _attn_kernel_unmasked,
            grid_spec=grid_spec,
            out_shape=out_shape,
            compiler_params=compiler_params,
            cost_estimate=cost,
        )(queries, keys, values)
        return out, weights

    # Normalize valid_lens to a per-(batch, query) int32 tensor (B, Q, 1) so
    # both the 1-D (per-batch) and 2-D (per-query) D2L cases are uniform.
    valid_lens = valid_lens.astype(jnp.int32)
    if valid_lens.ndim == 1:
        vl = jnp.broadcast_to(valid_lens[:, None], (B, Q))
    else:
        vl = valid_lens.reshape(B, Q)
    vl = vl.reshape(B, Q, 1)

    grid_spec = pltpu.PrefetchScalarGridSpec(
        num_scalar_prefetch=0,
        grid=grid,
        in_specs=[q_spec, k_spec, v_spec,
                  pl.BlockSpec((1, TQ, 1), lambda b, qi: (b, qi, 0))],
        out_specs=out_specs,
    )
    out, weights = pl.pallas_call(
        _attn_kernel_masked,
        grid_spec=grid_spec,
        out_shape=out_shape,
        compiler_params=compiler_params,
        cost_estimate=cost,
    )(queries, keys, values, vl)
    return out, weights


def _reference(queries, keys, values, valid_lens=None):
    d = queries.shape[-1]
    scores = jnp.einsum("bqd,bkd->bqk", queries, keys) / math.sqrt(d)
    if valid_lens is not None:
        col = jnp.arange(scores.shape[-1])[None, None, :]
        mask = col < valid_lens[:, None, None]
        scores = jnp.where(mask, scores, -1000000.0)
    w = jax.nn.softmax(scores, axis=-1)
    return jnp.einsum("bqk,bkv->bqv", w, values), w


if __name__ == "__main__":
    key = jax.random.PRNGKey(0)
    k1, k2, k3 = jax.random.split(key, 3)

    B, Q, K, D, Dv = 2, 8, 8, 32, 32
    queries = jax.random.normal(k1, (B, Q, D), dtype=jnp.float32)
    keys = jax.random.normal(k2, (B, K, D), dtype=jnp.float32)
    values = jax.random.normal(k3, (B, K, Dv), dtype=jnp.float32)
    valid_lens = jnp.array([3, 6], dtype=jnp.int32)

    out, weights = dot_product_attention(queries, keys, values, valid_lens)
    out = jax.block_until_ready(out)
    weights = jax.block_until_ready(weights)

    ref_out, ref_w = _reference(queries, keys, values, valid_lens)
    # Tolerance relaxed (vs. 1e-5) because the softmax denominator uses the
    # EUP approximate reciprocal (pl.reciprocal(approx=True)).
    assert jnp.allclose(out, ref_out, atol=1e-2, rtol=1e-2), "output mismatch"
    assert jnp.allclose(weights, ref_w, atol=1e-2, rtol=1e-2), "weights mismatch"

    # Also exercise the valid_lens=None path (plain softmax, no mask input).
    out2, w2 = dot_product_attention(queries, keys, values, None)
    ref_out2, ref_w2 = _reference(queries, keys, values, None)
    out2 = jax.block_until_ready(out2)
    w2 = jax.block_until_ready(w2)
    assert jnp.allclose(out2, ref_out2, atol=1e-2, rtol=1e-2), "unmasked out mismatch"
    assert jnp.allclose(w2, ref_w2, atol=1e-2, rtol=1e-2), "unmasked weights mismatch"

    # Per-query (B, Q) valid_lens path as well.
    vl2d = jnp.tile(jnp.arange(1, Q + 1, dtype=jnp.int32)[None, :], (B, 1))
    out3, w3 = dot_product_attention(queries, keys, values, vl2d)
    ref_out3, ref_w3 = _reference(
        queries, keys, values, None)  # build 2-D mask reference manually
    col = jnp.arange(K)[None, None, :]
    sc = jnp.einsum("bqd,bkd->bqk", queries, keys) / math.sqrt(D)
    sc = jnp.where(col < vl2d[:, :, None], sc, -1000000.0)
    ref_w3 = jax.nn.softmax(sc, axis=-1)
    ref_out3 = jnp.einsum("bqk,bkv->bqv", ref_w3, values)
    out3 = jax.block_until_ready(out3)
    assert jnp.allclose(out3, ref_out3, atol=1e-2, rtol=1e-2), "2D-vl out mismatch"
    assert jnp.allclose(w3, ref_w3, atol=1e-2, rtol=1e-2), "2D-vl weights mismatch"

    print("KERNEL_OK")
</pallas_src>

<mosaic_0001>
module attributes {stable_mosaic.version = 11 : i64} {
  func.func @_attn_kernel_masked(%arg0: i32, %arg1: i32, %arg2: memref<1x8x32xf32, #tpu.memory_space<vmem>>, %arg3: memref<1x8x32xf32, #tpu.memory_space<vmem>>, %arg4: memref<1x8x32xf32, #tpu.memory_space<vmem>>, %arg5: memref<1x8x1xi32, #tpu.memory_space<vmem>>, %arg6: memref<1x8x32xf32, #tpu.memory_space<vmem>>, %arg7: memref<1x8x8xf32, #tpu.memory_space<vmem>>) attributes {dimension_semantics = [#tpu.dimension_semantics<parallel>, #tpu.dimension_semantics<parallel>], iteration_bounds = array<i64: 2, 1>, scalar_prefetch = 0 : i64, scratch_operands = 0 : i64, tpu.core_type = #tpu.core_type<tc>, window_params = [{transform_indices = @transform_0, window_bounds = array<i64: 1, 8, 32>}, {transform_indices = @transform_1, window_bounds = array<i64: 1, 8, 32>}, {transform_indices = @transform_2, window_bounds = array<i64: 1, 8, 32>}, {transform_indices = @transform_3, window_bounds = array<i64: 1, 8, 1>}, {transform_indices = @transform_4, window_bounds = array<i64: 1, 8, 32>}, {transform_indices = @transform_5, window_bounds = array<i64: 1, 8, 8>}]} {
    %c0 = arith.constant 0 : index
    %c0_0 = arith.constant 0 : index
    %c0_1 = arith.constant 0 : index
    %0 = vector.load %arg2[%c0, %c0_0, %c0_1] : memref<1x8x32xf32, #tpu.memory_space<vmem>>, vector<1x8x32xf32>
    %1 = vector.shape_cast %0 : vector<1x8x32xf32> to vector<8x32xf32>
    %c0_2 = arith.constant 0 : index
    %c0_3 = arith.constant 0 : index
    %c0_4 = arith.constant 0 : index
    %2 = vector.load %arg3[%c0_2, %c0_3, %c0_4] : memref<1x8x32xf32, #tpu.memory_space<vmem>>, vector<1x8x32xf32>
    %3 = vector.shape_cast %2 : vector<1x8x32xf32> to vector<8x32xf32>
    %c0_5 = arith.constant 0 : index
    %c0_6 = arith.constant 0 : index
    %c0_7 = arith.constant 0 : index
    %4 = vector.load %arg4[%c0_5, %c0_6, %c0_7] : memref<1x8x32xf32, #tpu.memory_space<vmem>>, vector<1x8x32xf32>
    %5 = vector.shape_cast %4 : vector<1x8x32xf32> to vector<8x32xf32>
    %cst = arith.constant dense<0.000000e+00> : vector<8x8xf32>
    %6 = tpu.matmul %1, %3, %cst {dimension_numbers = #tpu.dot_dimension_numbers<[1], [1], [0], [0], [0, 0, 1, 0], [], []>} : vector<8x32xf32>, vector<8x32xf32>, vector<8x8xf32> -> vector<8x8xf32>
    %c0_8 = arith.constant 0 : index
    %c0_9 = arith.constant 0 : index
    %c0_10 = arith.constant 0 : index
    %7 = vector.load %arg5[%c0_8, %c0_9, %c0_10] : memref<1x8x1xi32, #tpu.memory_space<vmem>>, vector<1x8x1xi32>
    %8 = vector.shape_cast %7 : vector<1x8x1xi32> to vector<8x1xi32>
    %9 = tpu.iota {dimensions = array<i32: 1>} : vector<8x8xi32>
    %10 = vector.broadcast %8 : vector<8x1xi32> to vector<8x8xi32>
    %11 = arith.cmpi slt, %9, %10 : vector<8x8xi32>
    %cst_11 = arith.constant 0.176776692 : f32
    %12 = vector.broadcast %cst_11 : f32 to vector<8x8xf32>
    %13 = arith.mulf %6, %12 : vector<8x8xf32>
    %cst_12 = arith.constant -1.000000e+06 : f32
    %14 = vector.broadcast %cst_12 : f32 to vector<8x8xf32>
    %15 = arith.select %11, %13, %14 : vector<8x8xi1>, vector<8x8xf32>
    %cst_13 = arith.constant dense<0xFF800000> : vector<8xf32>
    %16 = vector.multi_reduction <maximumf>, %15, %cst_13 [1] : vector<8x8xf32> to vector<8xf32>
    %17 = vector.shape_cast %16 : vector<8xf32> to vector<8x1xf32>
    %18 = vector.broadcast %17 : vector<8x1xf32> to vector<8x8xf32>
    %19 = arith.subf %15, %18 : vector<8x8xf32>
    %20 = math.exp %19 : vector<8x8xf32>
    %cst_14 = arith.constant dense<0.000000e+00> : vector<8xf32>
    %21 = vector.multi_reduction <add>, %20, %cst_14 [1] : vector<8x8xf32> to vector<8xf32>
    %22 = vector.shape_cast %21 : vector<8xf32> to vector<8x1xf32>
    %23 = tpu.reciprocal %22 {approx = true} : vector<8x1xf32> -> vector<8x1xf32>
    %24 = vector.broadcast %23 : vector<8x1xf32> to vector<8x8xf32>
    %25 = arith.mulf %20, %24 : vector<8x8xf32>
    %cst_15 = arith.constant dense<0.000000e+00> : vector<8x32xf32>
    %26 = tpu.matmul %25, %5, %cst_15 {dimension_numbers = #tpu.dot_dimension_numbers<[1], [0], [0], [1], [0, 0, 1, 1], [], []>} : vector<8x8xf32>, vector<8x32xf32>, vector<8x32xf32> -> vector<8x32xf32>
    %c0_16 = arith.constant 0 : index
    %c0_17 = arith.constant 0 : index
    %c0_18 = arith.constant 0 : index
    %27 = vector.load %arg6[%c0_16, %c0_17, %c0_18] : memref<1x8x32xf32, #tpu.memory_space<vmem>>, vector<1x8x32xf32>
    %28 = vector.shape_cast %27 : vector<1x8x32xf32> to vector<8x32xf32>
    %29 = vector.shape_cast %26 : vector<8x32xf32> to vector<1x8x32xf32>
    tpu.vector_store %arg6[%c0_16, %c0_17, %c0_18], %29 {strides = array<i32>} : memref<1x8x32xf32, #tpu.memory_space<vmem>>, vector<1x8x32xf32>,
    %c0_19 = arith.constant 0 : index
    %c0_20 = arith.constant 0 : index
    %c0_21 = arith.constant 0 : index
    %30 = vector.load %arg7[%c0_19, %c0_20, %c0_21] : memref<1x8x8xf32, #tpu.memory_space<vmem>>, vector<1x8x8xf32>
    %31 = vector.shape_cast %30 : vector<1x8x8xf32> to vector<8x8xf32>
    %32 = vector.shape_cast %25 : vector<8x8xf32> to vector<1x8x8xf32>
    tpu.vector_store %arg7[%c0_19, %c0_20, %c0_21], %32 {strides = array<i32>} : memref<1x8x8xf32, #tpu.memory_space<vmem>>, vector<1x8x8xf32>,
    return
  }
  func.func @transform_0(%arg0: i32, %arg1: i32) -> (i32, i32, i32) {
    %c0_i32 = arith.constant 0 : i32
    %c0_i32_0 = arith.constant 0 : i32
    return %arg0, %arg1, %c0_i32 : i32, i32, i32
  }
  func.func @transform_1(%arg0: i32, %arg1: i32) -> (i32, i32, i32) {
    %c0_i32 = arith.constant 0 : i32
    %c0_i32_0 = arith.constant 0 : i32
    %c0_i32_1 = arith.constant 0 : i32
    return %arg0, %c0_i32, %c0_i32_0 : i32, i32, i32
  }
  func.func @transform_2(%arg0: i32, %arg1: i32) -> (i32, i32, i32) {
    %c0_i32 = arith.constant 0 : i32
    %c0_i32_0 = arith.constant 0 : i32
    %c0_i32_1 = arith.constant 0 : i32
    return %arg0, %c0_i32, %c0_i32_0 : i32, i32, i32
  }
  func.func @transform_3(%arg0: i32, %arg1: i32) -> (i32, i32, i32) {
    %c0_i32 = arith.constant 0 : i32
    %c0_i32_0 = arith.constant 0 : i32
    return %arg0, %arg1, %c0_i32 : i32, i32, i32
  }
  func.func @transform_4(%arg0: i32, %arg1: i32) -> (i32, i32, i32) {
    %c0_i32 = arith.constant 0 : i32
    %c0_i32_0 = arith.constant 0 : i32
    return %arg0, %arg1, %c0_i32 : i32, i32, i32
  }
  func.func @transform_5(%arg0: i32, %arg1: i32) -> (i32, i32, i32) {
    %c0_i32 = arith.constant 0 : i32
    %c0_i32_0 = arith.constant 0 : i32
    return %arg0, %arg1, %c0_i32 : i32, i32, i32
  }
}

</mosaic_0001>

<bundles_post_ra>
// kernel: tpu_custom_call.1
= control target key start
LH: loop header
LB: loop body
LE: loop exit
PB: predicated region body
PF: predicated region fallthrough
CT: control target
= control target key end

     0   :  { %11 = vsyncpa [#allocation3], 0  ;;  %s1340_s0 = inlined_call_operand.vmem [shape: f32[2,8,32], index: 0, kind: input, shape index: {}]   ;;  %s1341_s1 = inlined_call_operand.hbm [shape: f32[2,8,32], index: 1, kind: input, shape index: {}]   ;;  %s1342_s2 = inlined_call_operand.hbm [shape: f32[2,8,32], index: 2, kind: input, shape index: {}]   ;;  %s1343_s3 = inlined_call_operand.vmem [shape: s32[2,8,1], index: 3, kind: input, shape index: {}]   ;;  %s1344_s4 = inlined_call_operand.hbm [shape: f32[2,8,32], index: 4, kind: output, shape index: {0}]   ;;  %s1345_s5 = inlined_call_operand.hbm [shape: f32[2,8,8], index: 5, kind: output, shape index: {1}]  }
   0x1   :  { %13 = vsyncpa [#allocation3 + $0x1], 0 }
   0x2   :  { %14 = vsyncpa [#allocation6], 0 }
   0x3   :  { %16 = vsyncpa [#allocation6 + $0x1], 0 }
   0x4   :  { %17 = vsyncpa [#allocation4], 0 }
   0x5   :  { %19 = vsyncpa [#allocation4 + $0x1], 0 }
   0x6   :  { %20 = vsyncpa [#allocation9], 0 }
   0x7   :  { %22 = vsyncpa [#allocation9 + $0x1], 0  ;;  %s1070_s18 = smov 0   ;;  %s1072_s19 = smov 0  }
   0x8   :  { %s1074_s20 = smov 0   ;;  %s1076_s21 = smov 0  }
   0x9   :  { %s1078_s22 = smov 0   ;;  %s1080_s23 = smov 0  }
   0xa LB: > { %s735_s24 = sadd.s32 4294967295, %s1031_s23   ;;  %s736_s25 = sadd.s32 4294967294, %s1031_s23   ;;  %s1031_s23 = sphi %s1080_s23, %s28_s23   ;;  %s1027_s22 = sphi %s1078_s22, %s1365_s22   ;;  %s1023_s21 = sphi %s1076_s21, %s1364_s21   ;;  %s1019_s20 = sphi %s1074_s20, %s1363_s20   ;;  %s1015_s19 = sphi %s1072_s19, %s1362_s19   ;;  %s1011_s18 = sphi %s1070_s18, %s1361_s18  }
   0xb   : > { %s40_s26 = sadd.s32 1, %s1027_s22  ;;  %s75_s27 = sadd.s32 1, %s1019_s20 }
   0xc   : > { %p42_p0 = scmp.ge.s32.totalorder %s40_s26, 2  ;;  %p82_p1 = scmp.ne.s32.totalorder %s1019_s20, %s1015_s19 }
   0xd   : > { %p83_p2 = scmp.eq.s32.totalorder %s1031_s23, 0  ;;  %p88_p3 = scmp.ne.s32.totalorder %s1015_s19, %s1011_s18 }
   0xe   : > { %s1367_s26 = smov (%p42_p0, %s40_s26), 0  ;;  %p89_p5 = scmp.eq.s32.totalorder %s735_s24, 0 }
   0xf   : > { %p1111_p4 = por %p83_p2, %p82_p1  ;;  %s72_s29 = ssub.s32 %s1027_s22, %s1367_s26 }
  0x10   : > { %p168_p6 = scmp.eq.s32.totalorder %s735_s24, 1  ;;  %p73_p7 = scmp.eq.s32.totalorder %s72_s29, 0 }
  0x11   : > { %p1117_p8 = por %p89_p5, %p88_p3  ;;  %p174_p10 = scmp.eq.s32.totalorder %s736_s25, 1 }
  0x12   : > { %p1121_p9 = por %p168_p6, %p82_p1  ;;  %p795_p13 = scmp.lt.s32.totalorder %s1031_s23, 2 }
  0x13   : > { %s1349_s30 = scalar_select %p1117_p8, 1, 0 }
  0x14   : > { %s1350_s6 = scalar_select %p1121_p9, 1, 0 }
  0x15   : > { %s1126_s7 = scalar_select %p73_p7, %s1019_s20, %s75_s27  }
  0x16   : > { %p1128_p11 = por %p174_p10, %p88_p3  ;;  %s1135_s9 = sand.u32 1, %s1019_s20  }
  0x17   : > { %s739_s10 = sshll.u32 %s1135_s9, 3  ;;  %s740_s11 = sshll.u32 %s1027_s22, 7 }
  0x18   : > { %s1351_s8 = scalar_select %p1128_p11, 1, 0 }
  0x19   : > { %s1144_s14 = scalar_lea.hbm %s1341_s1, %s740_s11  ;;  %s236_s15 = scalar_lea.vmem [#allocation2], %s739_s10 }
  0x1a   : > { %s243_s16 = sshll.u32 %s236_s15, 4  ;;  %p1152_p0 = pnand %p795_p13, %p1111_p4  ;;  %s1148_s16 = int_to_ptr.vmem [resolvable:$true] %s243_s16 }
  0x1b   : > { %s233_s24 = scalar_lea.sflag [#allocation3], %s1135_s9  ;;  %s853_s25 = scalar_lea.hbm %s1144_s14, 128 }
  0x1c   : > { %p854_p3 = scmp.ne.s32.totalorder %s1144_s14, %s853_s25  ;;  %p855_p5 = pneg %p1152_p0 }
  0x1d   : > { %s858_s28 = scalar_lea.hbm %s1341_s1, 256  ;;  %p859_p4 = scmp.lt.u32.totalorder %s1144_s14, %s1341_s1 }
  0x1e   : > { %p856_p6 = pnand %p855_p5, %p854_p3  ;;  %p860_p10 = scmp.lt.u32.totalorder %s858_s28, %s853_s25 }
  0x1f   : > { %p862_p12 = scmp.lt.u32.totalorder %s853_s25, %s1144_s14 }
  0x20   : > { %p857_p7 = pneg %p856_p6  ;;  %p861_p13 = por %p860_p10, %p859_p4 }
  0x22   : > { %p863_p1 = por %p862_p12, %p861_p13 }
  0x24   : > { %p864_p2 = pnand %p863_p1, %p857_p7 }
  0x26   : > { %867 = shalt.err (!%p864_p2)
}
  0x27   : > { %s868_s15 = scalar_lea.vmem %s1148_s16, 128  ;;  %s1033_s27 = smov [#allocation2]  }
  0x28   : > { %p869_p3 = scmp.ne.s32.totalorder %s1148_s16, %s868_s15  ;;  %s873_s29 = sshll.u32 %s1033_s27, 4  ;;  %s874_s29 = int_to_ptr.vmem [resolvable:$false] %s873_s29 }
  0x29   : > { %s875_s12 = scalar_lea.vmem %s874_s29, 256  ;;  %p876_p9 = scmp.lt.s32.totalorder %s1148_s16, %s874_s29 }
  0x2a   : > { %p871_p6 = pnand %p869_p3, %p855_p5  ;;  %p877_p4 = scmp.lt.s32.totalorder %s875_s12, %s868_s15 }
  0x2c   : > { %p872_p11 = pneg %p871_p6  ;;  %p878_p10 = por %p877_p4, %p876_p9 }
  0x2e   : > { %p879_p12 = pnand %p878_p10, %p872_p11 }
  0x30   : > { %882 = shalt.err (!%p879_p12)
}
  0x31   : > { %784 = dma.hbm_to_vmem [thread:$0]  (!%p1152_p0), %s1144_s14, 128, %s1148_s16, %s233_s24  }
  0x32   : > { %p1353_p1 = scmp.lt.s32.totalorder %s1031_s23, 3  ;;  %p1354_p2 = scmp.ge.s32.totalorder %s1031_s23, 1 }
  0x33   : > { %s1197_s15 = scalar_lea.hbm %s1342_s2, %s740_s11  ;;  %s254_s27 = scalar_lea.vmem [#allocation5], %s739_s10 }
  0x34   : > { %p1188_p7 = pnand %p1354_p2, %p1353_p1  ;;  %s261_s29 = sshll.u32 %s254_s27, 4  ;;  %s262_s29 = int_to_ptr.vmem [resolvable:$true] %s261_s29 }
  0x35   : > { %s251_s14 = scalar_lea.sflag [#allocation6], %s1135_s9  ;;  %s883_s16 = scalar_lea.hbm %s1197_s15, 128 }
  0x36   : > { %s1355_s25 = scalar_select %p1188_p7, 1, 0 }
  0x37   : > { %p884_p9 = scmp.ne.s32.totalorder %s1197_s15, %s883_s16  ;;  %s888_s11 = scalar_lea.hbm %s1342_s2, 256 }
  0x38   : > { %p889_p3 = scmp.lt.u32.totalorder %s1197_s15, %s1342_s2  ;;  %p890_p6 = scmp.lt.u32.totalorder %s888_s11, %s883_s16 }
  0x39   : > { %p886_p11 = pnand %p884_p9, %p855_p5  ;;  %p892_p10 = scmp.lt.u32.totalorder %s883_s16, %s1197_s15 }
  0x3a   : > { %p891_p4 = por %p890_p6, %p889_p3 }
  0x3b   : > { %p887_p13 = pneg %p886_p11 }
  0x3c   : > { %p893_p12 = por %p892_p10, %p891_p4 }
  0x3e   : > { %p894_p1 = pnand %p893_p12, %p887_p13 }
  0x40   : > { %897 = shalt.err (!%p894_p1)
}
  0x41   : > { %s898_s9 = scalar_lea.vmem %s262_s29, 128  ;;  %s1034_s10 = smov [#allocation5]  }
  0x42   : > { %p899_p2 = scmp.ne.s32.totalorder %s262_s29, %s898_s9  ;;  %s903_s27 = sshll.u32 %s1034_s10, 4  ;;  %s904_s27 = int_to_ptr.vmem [resolvable:$false] %s903_s27 }
  0x43   : > { %s905_s24 = scalar_lea.vmem %s904_s27, 256  ;;  %p906_p8 = scmp.lt.s32.totalorder %s262_s29, %s904_s27 }
  0x44   : > { %p901_p9 = pnand %p899_p2, %p855_p5  ;;  %p907_p7 = scmp.lt.s32.totalorder %s905_s24, %s898_s9 }
  0x46   : > { %p902_p11 = pneg %p901_p9  ;;  %p908_p3 = por %p907_p7, %p906_p8 }
  0x48   : > { %p909_p6 = pnand %p908_p3, %p902_p11 }
  0x4a   : > { %912 = shalt.err (!%p909_p6)
}
  0x4b   : > { %787 = dma.hbm_to_vmem [thread:$0]  (!%p1152_p0), %s1197_s15, 128, %s262_s29, %s251_s14  }
  0x4c   : > { %p1356_p13 = scmp.ne.s32.totalorder %s1355_s25, 0 }
  0x4d   : > { %s1224_s16 = sand.u32 (!%p1356_p13), 1, %s1015_s19   ;;  %p1357_p8 = scmp.ne.s32.totalorder (!%p1356_p13), %s1349_s30, 0 }
  0x4e   : > { %280 = sbr.rel (%p1356_p13) target bundleno = 851 (0x353), region = 36  ;;  %s1227_s12 = sshll.u32 (!%p1356_p13), %s1224_s16, 3 }
  0x4f   : > { %s283_s11 = scalar_lea.sflag (!%p1356_p13), [#allocation3], %s1224_s16  ;;  %s286_s28 = scalar_lea.vmem (!%p1356_p13), [#allocation2], %s1227_s12 }
  0x55   : > { %994 = dma.done.wait (%p1357_p8), %s283_s11, 128  }
  0x56   : > { %996 = vsyncadd (%p1357_p8), %s283_s11, 4294967168  ;;  %s292_s17 = scalar_lea.sflag [#allocation6], %s1224_s16  ;;  %s295_s25 = scalar_lea.vmem [#allocation5], %s1227_s12 }
  0x57   : > { %998 = dma.done.wait (%p1357_p8), %s292_s17, 128  }
  0x58   : > { %1000 = vsyncadd (%p1357_p8), %s292_s17, 4294967168  ;;  %p346_p0 = scmp.lt.s32.totalorder %s1023_s21, 1  ;;  %v1035_v0 = vmov 0.0   ;;  %vm1036_vm0 = vmmov 0   ;;  %v1037_v1 = vmov 0   ;;  %vm363_vm1 = vcmask 261120  }
  0x59   : > { %763 = vmatprep.subr.mxu0 %v1035_v0  ;;  %765 = vmatprep.mubr.msk.f32.mxu0 %vm1036_vm0, %v1035_v0  ;;  %v361_v2 = vld [vmem:[%s286_s28] sm:$0xff]  ;;  %v441_v5 = vlaneseq  ;;  %vm449_vm3 = vcmask 64512   ;;  %v362_v18 = vld [vmem:[%s295_s25] sm:$0xff]  ;;  %s345_s24 = scalar_lea.vmem [#allocation8], %s1227_s12  ;;  %s755_s11 = sshll.u32 %s1023_s21, 7 }
  0x5a   : > { %s347_s15 = scalar_select %p346_p0, %s1023_s21, 1  ;;  %848 = vset.pattern.permute.xlu0 %v1037_v1  ;;  %768 = vmatprep.subr.mxu1 %v1035_v0 }
  0x5b   : > { %770 = vmatprep.mubr.msk.f32.mxu1 %vm1036_vm0, %v1035_v0  ;;  %764 = vmatpush3.xpose.msk.msra.mxu0 %vm363_vm1, %v361_v2  ;;  %v442_v6 = vand.u32 127, %v441_v5  ;;  %s542_s25 = scalar_lea.sflag [#allocation9], %s1224_s16  ;;  %p1358_p7 = scmp.ne.s32.totalorder %s1350_s6, 0 }
  0x5c   : > { %s748_s29 = sshll.u32 %s347_s15, 3  ;;  %769 = vmatpush3.msra.mxu1 %v362_v18  ;;  %s1264_s15 = scalar_lea.hbm %s1345_s5, %s755_s11 }
  0x5d   : > { %s352_s9 = scalar_lea.vmem %s1340_s0, %s748_s29  ;;  %s359_s27 = scalar_lea.vmem %s1343_s3, %s748_s29 }
  0x5e   : > { %v440_v3 = vld [vmem:[%s359_s27] sm:$0xff]  ;;  %s570_s29 = sshll.u32 %s345_s24, 4  ;;  %s1038_s13 = smov [#allocation8]   ;;  %s571_s29 = int_to_ptr.vmem [resolvable:$true] %s570_s29 }
  0x5f   : > { %v360_v4 = vld [vmem:[%s352_s9] sm:$0xff]  ;;  %444 = vperm.xlu0 %848, %v440_v3   ;;  %s913_s14 = scalar_lea.vmem %s571_s29, 128  ;;  %s917_s9 = sshll.u32 %s1038_s13, 4  ;;  %s918_s9 = int_to_ptr.vmem [resolvable:$false] %s917_s9 }
  0x60   : > { %766 = vmatmul.mubr.msk.f32.vlgmr.msra.gmra.mrb[0].mxu0 %vm363_vm1, %v360_v4  ;;  %p914_p5 = scmp.ne.s32.totalorder %s571_s29, %s913_s14  ;;  %s919_s30 = scalar_lea.vmem %s918_s9, 256 }
  0x61   : > { %p920_p12 = scmp.lt.s32.totalorder %s571_s29, %s918_s9  ;;  %p921_p1 = scmp.lt.s32.totalorder %s919_s30, %s913_s14 }
  0x62   : > { %p915_p4 = pnand %p914_p5, %p1358_p7 }
  0x63   : > { %p922_p2 = por %p921_p1, %p920_p12 }
  0x64   : > { %p916_p10 = pneg %p915_p4 }
  0x66   : > { %p923_p9 = pnand %p922_p2, %p916_p10 }
  0xde   : > { %v445_v7 = vpop.permute.xlu0 %444 }
  0xdf   : > { %vm446_vm2 = vcmp.lt.s32.totalorder %v442_v6, %v445_v7 }
 0x133   : > { %v436_v8 = vpop.f32.mrb[0].mxu0 }
 0x134   : > { %v447_v9 = vmul.f32 0.17677669, %v436_v8  ;;  %v767_v10 = vpop.f32.mrb[1].mxu0 }
 0x136   : > { %v448_v11 = vsel %vm446_vm2, %v447_v9, -1000000.0 }
 0x137   : > { %v450_v12 = vsel %vm449_vm3, %v448_v11, -inf }
 0x138   : > { %451 = vmax.xlane.f32.xlu0 %v450_v12 }
 0x1c5   : > { %v452_v13 = vpop.xlane.xlu0 %451 }
 0x1c6   : > { %v453_v14 = vsub.f32 %v448_v11, %v452_v13 }
 0x1c8   : > { %v454_v15 = vmul.f32 1.442695, %v453_v14 }
 0x1ca   : > { %849 = vpow2.f32 %v454_v15 }
 0x1d4   : > { %v850_v16 = vpop.eup %849 }
 0x1d5   : > { %v456_v17 = vsel %vm449_vm3, %v850_v16, 0.0 }
 0x1d6   : > { %457 = vadd.xlane.f32.xlu1 %v456_v17 }
 0x263   : > { %v458_v19 = vpop.xlane.xlu1 %457 }
 0x264   : > { %851 = vrcp.f32 %v458_v19 }
 0x26e   : > { %v852_v20 = vpop.eup %851 }
 0x26f   : > { %v460_v21 = vmul.f32 %v852_v20, %v850_v16 }
 0x271   : > { %771 = vmatmul.mubr.msk.f32.vlgmr.msra.gmra.mrb[0].mxu1 %vm449_vm3, %v460_v21  ;;  %535 = vst.msk [vmem:[%s345_s24] sm:$0xff] %vm449_vm3, %v460_v21 }
 0x272   : > { %926 = shalt.err (!%p923_p9)
}
 0x273   : > { %s927_s10 = scalar_lea.hbm %s1264_s15, 128  ;;  %s931_s28 = scalar_lea.hbm %s1345_s5, 256 }
 0x274   : > { %p928_p11 = scmp.ne.s32.totalorder %s1264_s15, %s927_s10  ;;  %p932_p13 = scmp.lt.u32.totalorder %s1264_s15, %s1345_s5 }
 0x275   : > { %p933_p8 = scmp.lt.u32.totalorder %s931_s28, %s927_s10  ;;  %p935_p5 = scmp.lt.u32.totalorder %s927_s10, %s1264_s15 }
 0x276   : > { %p929_p3 = pnand %p928_p11, %p1358_p7 }
 0x277   : > { %p934_p0 = por %p933_p8, %p932_p13 }
 0x278   : > { %p930_p6 = pneg %p929_p3 }
 0x279   : > { %p936_p4 = por %p935_p5, %p934_p0 }
 0x27b   : > { %p937_p10 = pnand %p936_p4, %p930_p6 }
 0x27d   : > { %940 = shalt.err (!%p937_p10)
}
 0x27e   : > { %778 = dma.vmem_to_hbm [thread:$0]  (%p1358_p7), %s571_s29, 128, %s1264_s15, %s542_s25  }
 0x27f   : > { %s338_s14 = scalar_lea.vmem [#allocation7], %s1227_s12  ;;  %s1290_s24 = scalar_lea.hbm %s1344_s4, %s755_s11 }
 0x280   : > { %s556_s9 = sshll.u32 %s338_s14, 4  ;;  %s537_s10 = scalar_lea.sflag [#allocation4], %s1224_s16  ;;  %s1292_s9 = int_to_ptr.vmem [resolvable:$true] %s556_s9 }
 0x281   : > { %s941_s28 = scalar_lea.vmem %s1292_s9, 128  ;;  %s1039_s21 = smov [#allocation7]  }
 0x282   : > { %p942_p12 = scmp.ne.s32.totalorder %s1292_s9, %s941_s28  ;;  %s945_s12 = sshll.u32 %s1039_s21, 4  ;;  %s946_s12 = int_to_ptr.vmem [resolvable:$false] %s945_s12 }
 0x283   : > { %s947_s11 = scalar_lea.vmem %s946_s12, 256  ;;  %p948_p9 = scmp.lt.s32.totalorder %s1292_s9, %s946_s12 }
 0x284   : > { %p943_p1 = pnand %p942_p12, %p1358_p7  ;;  %p949_p11 = scmp.lt.s32.totalorder %s947_s11, %s941_s28 }
 0x286   : > { %p944_p2 = pneg %p943_p1  ;;  %p950_p3 = por %p949_p11, %p948_p9 }
 0x288   : > { %p951_p6 = pnand %p950_p3, %p944_p2 }
 0x344   : > { %v530_v22 = vpop.f32.mrb[0].mxu1 }
 0x345   : > { %534 = vst.msk [vmem:[%s338_s14] sm:$0xff] %vm363_vm1, %v530_v22  ;;  %v772_v23 = vpop.f32.mrb[1].mxu1 }
 0x346   : > { %954 = shalt.err (!%p951_p6)
}
 0x347   : > { %s955_s16 = scalar_lea.hbm %s1290_s24, 128  ;;  %s959_s25 = scalar_lea.hbm %s1344_s4, 256 }
 0x348   : > { %p956_p13 = scmp.ne.s32.totalorder %s1290_s24, %s955_s16  ;;  %p960_p5 = scmp.lt.u32.totalorder %s1290_s24, %s1344_s4 }
 0x349   : > { %p961_p4 = scmp.lt.u32.totalorder %s959_s25, %s955_s16  ;;  %p963_p12 = scmp.lt.u32.totalorder %s955_s16, %s1290_s24 }
 0x34a   : > { %p957_p8 = pnand %p956_p13, %p1358_p7 }
 0x34b   : > { %p962_p10 = por %p961_p4, %p960_p5 }
 0x34c   : > { %p958_p0 = pneg %p957_p8 }
 0x34d   : > { %p964_p1 = por %p963_p12, %p962_p10 }
 0x34f   : > { %p965_p2 = pnand %p964_p1, %p958_p0 }
 0x351   : > { %968 = shalt.err (!%p965_p2)
}
 0x352   : > { %777 = dma.vmem_to_hbm [thread:$0]  (%p1358_p7), %s1292_s9, 128, %s1290_s24, %s537_s10  }
 0x353 PF: > { %s582_s14 = sand.u32 1, %s1011_s18   ;;  %p1359_p9 = scmp.ne.s32.totalorder %s1351_s8, 0 }
 0x354   : > { %p1360_p11 = scmp.ge.s32.totalorder %s1031_s23, 2  ;;  %s583_s30 = scalar_lea.sflag [#allocation4], %s582_s14 }
 0x356   : > { %p789_p3 = pnand %p1360_p11, %p1359_p9 }
 0x358   : > { %1002 = dma.done.wait (!%p789_p3), %s583_s30, 128  }
 0x359   : > { %1004 = vsyncadd (!%p789_p3), %s583_s30, 4294967168  ;;  %s592_s27 = scalar_lea.sflag [#allocation9], %s582_s14 }
 0x35a   : > { %1006 = dma.done.wait (!%p789_p3), %s592_s27, 128  }
 0x35b   : > { %1008 = vsyncadd (!%p789_p3), %s592_s27, 4294967168  ;;  %s28_s23 = sadd.s32 1, %s1031_s23   ;;  %s1361_s18 = smov %s1015_s19 }
 0x35c   : > { %p25_p6 = scmp.ge.s32.totalorder %s28_s23, 4   ;;  %s1362_s19 = smov %s1019_s20 }
 0x35d   : > { %s1363_s20 = smov %s1126_s7  ;;  %s1364_s21 = smov %s1027_s22 }
 0x35e   : > { %s1365_s22 = smov %s1367_s26  ;;  %27 = sbr.rel (!%p25_p6) target bundleno = 10 (0xa), region = 117 }
 0x365   :  { %597 = vsyncpa [#allocation3], 1 }
 0x366   :  { %599 = vsyncpa [#allocation3 + $0x1], 1 }
 0x367   :  { %600 = vsyncpa [#allocation6], 1 }
 0x368   :  { %602 = vsyncpa [#allocation6 + $0x1], 1 }
 0x369   :  { %603 = vsyncpa [#allocation4], 1 }
 0x36a   :  { %605 = vsyncpa [#allocation4 + $0x1], 1 }
 0x36b   :  { %606 = vsyncpa [#allocation9], 1 }
 0x36c   :  { %608 = vsyncpa [#allocation9 + $0x1], 1 }

</bundles_post_ra>
